<compile_context>
chip_gen: v5e
topology: v5e:2x2
jax: 0.10.0
libtpu: 0.0.40
codegen_flags: <defaults>
</compile_context>

<pallas_src>
import functools

import jax
import jax.numpy as jnp
from jax.experimental import pallas as pl
from jax.experimental.pallas import tpu as pltpu

VMEM_LIMIT_BYTES = 32 * 1024 * 1024  # explicit; fits v7x (64 MiB) and v5e/v6e


def _round_up(x, m):
    return (x + m - 1) // m * m


# ---------------------------------------------------------------------------
# Kernel 1: fused 1x1-conv (matmul) + BatchNorm affine + SiLU, M-tiled.
# Three outputs because conv_head / bn2 / act2 are separate features.
# ---------------------------------------------------------------------------

def _matmul_bn_act_kernel(a_ref, b_ref, s_ref, t_ref, conv_ref, bn_ref, act_ref):
    acc = jnp.dot(a_ref[...].astype(jnp.bfloat16), b_ref[...],
                  preferred_element_type=jnp.float32)
    conv_ref[...] = acc
    bn = acc * s_ref[...] + t_ref[...]
    bn_ref[...] = bn
    act_ref[...] = bn * jax.nn.sigmoid(bn)


def fused_matmul_bn_act(x2d, w_bf16, scale, shift):
    m, cin = x2d.shape
    cout = w_bf16.shape[-1]
    tm = 256 if m >= 256 else _round_up(m, 8)
    mp = _round_up(m, tm)
    a = x2d if mp == m else jnp.pad(x2d, ((0, mp - m), (0, 0)))
    outs = pl.pallas_call(
        _matmul_bn_act_kernel,
        out_shape=[jax.ShapeDtypeStruct((mp, cout), jnp.float32)] * 3,
        grid=(mp // tm,),
        in_specs=[pl.BlockSpec((tm, cin), lambda i: (i, 0)),
                  pl.BlockSpec((cin, cout), lambda i: (0, 0)),
                  pl.BlockSpec((1, cout), lambda i: (0, 0)),
                  pl.BlockSpec((1, cout), lambda i: (0, 0))],
        out_specs=[pl.BlockSpec((tm, cout), lambda i: (i, 0))] * 3,
        compiler_params=pltpu.CompilerParams(
            dimension_semantics=("parallel",),
            vmem_limit_bytes=VMEM_LIMIT_BYTES),
    )(a.astype(jnp.float32), w_bf16,
      scale.reshape(1, cout).astype(jnp.float32),
      shift.reshape(1, cout).astype(jnp.float32))
    if mp != m:
        outs = [o[:m] for o in outs]
    return outs


# ---------------------------------------------------------------------------
# In-kernel 3x3 tap construction: pad once; for stride 2 split into 4 parity
# phases so every tap is a unit-stride static slice of a phase array.
# ---------------------------------------------------------------------------

def _make_phases(x_nhwc, stride):
    xp = jnp.pad(x_nhwc.astype(jnp.float32), ((0, 0), (1, 1), (1, 1), (0, 0)))
    if stride == 1:
        phases = [xp]
        tap_info = tuple((0, i, j) for i in range(3) for j in range(3))
    elif stride == 2:
        phases = [xp[:, pi::2, pj::2, :] for pi in range(2) for pj in range(2)]
        tap_info = tuple((2 * (i % 2) + (j % 2), i // 2, j // 2)
                         for i in range(3) for j in range(3))
    else:
        raise ValueError("stride must be 1 or 2")
    return phases, tap_info


# ---------------------------------------------------------------------------
# Kernel 2: fused full 3x3 conv + BN + SiLU (conv_stem / bn1 / act1 features).
# Grid over batch; one image per step; taps built in-kernel; whole-image dots.
# Outputs are (1, ho*wo, cout) dense slabs; wrapper reshapes to NHWC.
# ---------------------------------------------------------------------------

def _conv3x3_bn_act_kernel(*refs, n_phases, tap_info, ho, wo):
    phase_refs = refs[:n_phases]
    w_ref, s_ref, t_ref = refs[n_phases:n_phases + 3]
    conv_ref, bn_ref, act_ref = refs[n_phases + 3:]
    scale = s_ref[...]
    shift = t_ref[...]
    if wo % 8 == 0:
        # whole-image matmuls: M = ho*wo per dot
        acc = None
        for k, (p, ra, cs) in enumerate(tap_info):
            tap = phase_refs[p][0, ra:ra + ho, cs:cs + wo, :]     # (ho, wo, cin)
            tap2 = tap.reshape(ho * wo, tap.shape[-1])            # sublane-aligned
            d = jnp.dot(tap2.astype(jnp.bfloat16), w_ref[k],
                        preferred_element_type=jnp.float32)       # (ho*wo, cout)
            acc = d if acc is None else acc + d
        conv_ref[0] = acc
        bn = acc * scale + shift
        bn_ref[0] = bn
        act_ref[0] = bn * jax.nn.sigmoid(bn)
    else:
        # per-row fallback for non-sublane-aligned row widths
        for h in range(ho):
            acc = None
            for k, (p, ra, cs) in enumerate(tap_info):
                tap = phase_refs[p][0, h + ra, cs:cs + wo, :]     # (wo, cin)
                d = jnp.dot(tap.astype(jnp.bfloat16), w_ref[k],
                            preferred_element_type=jnp.float32)
                acc = d if acc is None else acc + d
            conv_ref[0, h * wo:(h + 1) * wo] = acc
            bn = acc * scale + shift
            bn_ref[0, h * wo:(h + 1) * wo] = bn
            act_ref[0, h * wo:(h + 1) * wo] = bn * jax.nn.sigmoid(bn)


def fused_conv3x3_bn_act(x_nhwc, w9_bf16, scale, shift, stride):
    n, hgt, wid, _cin = x_nhwc.shape
    cout = w9_bf16.shape[-1]
    ho = (hgt - 1) // stride + 1
    wo = (wid - 1) // stride + 1
    m = ho * wo
    phases, tap_info = _make_phases(x_nhwc, stride)
    kern = functools.partial(_conv3x3_bn_act_kernel, n_phases=len(phases),
                             tap_info=tap_info, ho=ho, wo=wo)
    in_specs = [pl.BlockSpec((1,) + p.shape[1:], lambda b: (b, 0, 0, 0))
                for p in phases]
    in_specs += [pl.BlockSpec(w9_bf16.shape, lambda b: (0, 0, 0)),
                 pl.BlockSpec((1, cout), lambda b: (0, 0)),
                 pl.BlockSpec((1, cout), lambda b: (0, 0))]
    out_spec = pl.BlockSpec((1, m, cout), lambda b: (b, 0, 0))
    outs = pl.pallas_call(
        kern,
        out_shape=[jax.ShapeDtypeStruct((n, m, cout), jnp.float32)] * 3,
        grid=(n,),
        in_specs=in_specs,
        out_specs=[out_spec] * 3,
        compiler_params=pltpu.CompilerParams(
            dimension_semantics=("parallel",),
            vmem_limit_bytes=VMEM_LIMIT_BYTES),
    )(*phases, w9_bf16,
      scale.reshape(1, cout).astype(jnp.float32),
      shift.reshape(1, cout).astype(jnp.float32))
    return [o.reshape(n, ho, wo, cout) for o in outs]


# ---------------------------------------------------------------------------
# Kernel 3: fused MBConv stage:
#   depthwise 3x3 (VPU) -> BN -> SiLU -> 1x1 pointwise (MXU) -> BN.
# Depthwise intermediate stays in VMEM/registers; pointwise is a single
# whole-image dot when the row width is sublane-aligned.
# ---------------------------------------------------------------------------

def _mbconv_kernel(*refs, n_phases, tap_info, ho, wo):
    phase_refs = refs[:n_phases]
    (dw_w_ref, dw_s_ref, dw_t_ref,
     pw_w_ref, pw_s_ref, pw_t_ref) = refs[n_phases:n_phases + 6]
    out_ref = refs[n_phases + 6]
    pw_s = pw_s_ref[...]
    pw_t = pw_t_ref[...]
    # depthwise 3x3 over the whole image (pure VPU), folded BN + SiLU in f32
    acc = None
    for k, (p, ra, cs) in enumerate(tap_info):
        tap = phase_refs[p][0, ra:ra + ho, cs:cs + wo, :]          # (ho, wo, cin)
        c = tap * dw_w_ref[k]                                      # (1, cin) bcast
        acc = c if acc is None else acc + c
    y = acc * dw_s_ref[...] + dw_t_ref[...]
    y = y * jax.nn.sigmoid(y)
    if wo % 8 == 0:
        y2 = y.reshape(ho * wo, y.shape[-1])
        z = jnp.dot(y2.astype(jnp.bfloat16), pw_w_ref[...],
                    preferred_element_type=jnp.float32)            # (ho*wo, cout)
        out_ref[0] = z * pw_s + pw_t
    else:
        for h in range(ho):
            z = jnp.dot(y[h].astype(jnp.bfloat16), pw_w_ref[...],
                        preferred_element_type=jnp.float32)        # (wo, cout)
            out_ref[0, h * wo:(h + 1) * wo] = z * pw_s + pw_t


def fused_mbconv(x_nhwc, dw_w9, dw_scale, dw_shift,
                 pw_w_bf16, pw_scale, pw_shift, stride):
    n, hgt, wid, cin = x_nhwc.shape
    cout = pw_w_bf16.shape[-1]
    ho = (hgt - 1) // stride + 1
    wo = (wid - 1) // stride + 1
    m = ho * wo
    phases, tap_info = _make_phases(x_nhwc, stride)
    kern = functools.partial(_mbconv_kernel, n_phases=len(phases),
                             tap_info=tap_info, ho=ho, wo=wo)
    in_specs = [pl.BlockSpec((1,) + p.shape[1:], lambda b: (b, 0, 0, 0))
                for p in phases]
    in_specs += [pl.BlockSpec((9, 1, cin), lambda b: (0, 0, 0)),
                 pl.BlockSpec((1, cin), lambda b: (0, 0)),
                 pl.BlockSpec((1, cin), lambda b: (0, 0)),
                 pl.BlockSpec((cin, cout), lambda b: (0, 0)),
                 pl.BlockSpec((1, cout), lambda b: (0, 0)),
                 pl.BlockSpec((1, cout), lambda b: (0, 0))]
    out_spec = pl.BlockSpec((1, m, cout), lambda b: (b, 0, 0))
    out = pl.pallas_call(
        kern,
        out_shape=jax.ShapeDtypeStruct((n, m, cout), jnp.float32),
        grid=(n,),
        in_specs=in_specs,
        out_specs=out_spec,
        compiler_params=pltpu.CompilerParams(
            dimension_semantics=("parallel",),
            vmem_limit_bytes=VMEM_LIMIT_BYTES),
    )(*phases,
      dw_w9.reshape(9, 1, cin).astype(jnp.float32),
      dw_scale.reshape(1, cin).astype(jnp.float32),
      dw_shift.reshape(1, cin).astype(jnp.float32),
      pw_w_bf16,
      pw_scale.reshape(1, cout).astype(jnp.float32),
      pw_shift.reshape(1, cout).astype(jnp.float32))
    return out.reshape(n, ho, wo, cout)


# ---------------------------------------------------------------------------
# Deterministic parameter construction (folded inference BatchNorm)
# ---------------------------------------------------------------------------

def _bn_params(key, c, eps=1e-3):
    k1, k2, k3, k4 = jax.random.split(key, 4)
    gamma = 1.0 + 0.1 * jax.random.normal(k1, (c,))
    beta = 0.1 * jax.random.normal(k2, (c,))
    mean = 0.1 * jax.random.normal(k3, (c,))
    var = 1.0 + 0.1 * jax.random.uniform(k4, (c,))
    scale = gamma / jnp.sqrt(var + eps)
    shift = beta - mean * scale
    return scale.astype(jnp.float32), shift.astype(jnp.float32)


def make_encoder_params(key):
    ks = jax.random.split(key, 32)
    c_stem, widths, strides = 16, [16, 24, 32], [1, 2, 2]
    c_head = 64
    params = {
        # MXU weights stored in bf16 (f32 accumulation in-kernel).
        "stem_w": (0.1 * jax.random.normal(ks[0], (9, 3, c_stem))).astype(jnp.bfloat16),
        "bn1": _bn_params(ks[1], c_stem),
        "blocks": [],
        "head_w": (0.1 * jax.random.normal(ks[2], (widths[-1], c_head))).astype(jnp.bfloat16),
        "bn2": _bn_params(ks[3], c_head),
    }
    cin = c_stem
    for si, (cout, st) in enumerate(zip(widths, strides)):
        kb = jax.random.split(ks[4 + si], 4)
        params["blocks"].append({
            "stride": st,
            "dw_w": (0.1 * jax.random.normal(kb[0], (9, cin))).astype(jnp.float32),
            "dw_bn": _bn_params(kb[1], cin),
            "pw_w": (0.1 * jax.random.normal(kb[2], (cin, cout))).astype(jnp.bfloat16),
            "pw_bn": _bn_params(kb[3], cout),
        })
        cin = cout
    return params


# ---------------------------------------------------------------------------
# Encoder forward (mirrors the PyTorch module traversal / feature list)
# ---------------------------------------------------------------------------

def encoder_forward(params, x_nchw):
    features = [x_nchw]
    x = jnp.transpose(x_nchw, (0, 2, 3, 1))  # NHWC for the kernels

    def push(y_nhwc):
        # single NCHW transpose per feature, at the boundary only
        features.append(jnp.transpose(y_nhwc, (0, 3, 1, 2)))
        return y_nhwc

    # conv_stem + bn1 + act1 -> one fused kernel, three feature outputs
    conv1, bn1, act1 = fused_conv3x3_bn_act(x, params["stem_w"],
                                            *params["bn1"], stride=2)
    push(conv1)
    push(bn1)
    x = push(act1)

    # blocks: one fused MBConv kernel (and one feature) per stage
    for st in params["blocks"]:
        x = push(fused_mbconv(x, st["dw_w"], *st["dw_bn"],
                              st["pw_w"], *st["pw_bn"], stride=st["stride"]))

    # conv_head + bn2 + act2 -> one fused M-tiled matmul kernel
    n, hh, ww, cin = x.shape
    cout = params["head_w"].shape[-1]
    conv_h, bn2, act2 = fused_matmul_bn_act(x.reshape(n * hh * ww, cin),
                                            params["head_w"], *params["bn2"])
    push(conv_h.reshape(n, hh, ww, cout))
    push(bn2.reshape(n, hh, ww, cout))
    push(act2.reshape(n, hh, ww, cout))

    # global_pool = nn.Identity(); classifier = nn.Identity()
    features.append(features[-1])
    features.append(features[-1])
    return features


if __name__ == "__main__":
    key = jax.random.PRNGKey(0)
    k_x, k_p = jax.random.split(key)
    x = jax.random.normal(k_x, (2, 3, 16, 16), dtype=jnp.float32)  # NCHW
    params = make_encoder_params(k_p)

    feats = encoder_forward(params, x)
    for f in feats:
        jax.block_until_ready(f)

    # sanity: expected feature count and a few shapes
    assert len(feats) == 12
    assert feats[0].shape == (2, 3, 16, 16)
    assert feats[1].shape == (2, 16, 8, 8)      # conv_stem
    assert feats[3].shape == (2, 16, 8, 8)      # act1
    assert feats[6].shape == (2, 32, 2, 2)      # last block stage
    assert feats[7].shape == (2, 64, 2, 2)      # conv_head
    print("KERNEL_OK")
</pallas_src>

<mosaic_0001>
module attributes {stable_mosaic.version = 11 : i64} {
  func.func @_conv3x3_bn_act_kernel(%arg0: i32, %arg1: memref<1x9x9x3xf32, #tpu.memory_space<vmem>>, %arg2: memref<1x9x9x3xf32, #tpu.memory_space<vmem>>, %arg3: memref<1x9x9x3xf32, #tpu.memory_space<vmem>>, %arg4: memref<1x9x9x3xf32, #tpu.memory_space<vmem>>, %arg5: memref<9x3x16xbf16, #tpu.memory_space<vmem>>, %arg6: memref<1x16xf32, #tpu.memory_space<vmem>>, %arg7: memref<1x16xf32, #tpu.memory_space<vmem>>, %arg8: memref<1x64x16xf32, #tpu.memory_space<vmem>>, %arg9: memref<1x64x16xf32, #tpu.memory_space<vmem>>, %arg10: memref<1x64x16xf32, #tpu.memory_space<vmem>>) attributes {dimension_semantics = [#tpu.dimension_semantics<parallel>], iteration_bounds = array<i64: 2>, scalar_prefetch = 0 : i64, scratch_operands = 0 : i64, tpu.core_type = #tpu.core_type<tc>, window_params = [{transform_indices = @transform_0, window_bounds = array<i64: 1, 9, 9, 3>}, {transform_indices = @transform_1, window_bounds = array<i64: 1, 9, 9, 3>}, {transform_indices = @transform_2, window_bounds = array<i64: 1, 9, 9, 3>}, {transform_indices = @transform_3, window_bounds = array<i64: 1, 9, 9, 3>}, {pipeline_mode = #tpu.pipeline_mode<synchronous>, transform_indices = @transform_4, window_bounds = array<i64: 9, 3, 16>}, {pipeline_mode = #tpu.pipeline_mode<synchronous>, transform_indices = @transform_5, window_bounds = array<i64: 1, 16>}, {pipeline_mode = #tpu.pipeline_mode<synchronous>, transform_indices = @transform_6, window_bounds = array<i64: 1, 16>}, {transform_indices = @transform_7, window_bounds = array<i64: 1, 64, 16>}, {transform_indices = @transform_8, window_bounds = array<i64: 1, 64, 16>}, {transform_indices = @transform_9, window_bounds = array<i64: 1, 64, 16>}]} {
    %c0 = arith.constant 0 : index
    %c0_0 = arith.constant 0 : index
    %0 = vector.load %arg6[%c0, %c0_0] : memref<1x16xf32, #tpu.memory_space<vmem>>, vector<1x16xf32>
    %c0_1 = arith.constant 0 : index
    %c0_2 = arith.constant 0 : index
    %1 = vector.load %arg7[%c0_1, %c0_2] : memref<1x16xf32, #tpu.memory_space<vmem>>, vector<1x16xf32>
    %c0_3 = arith.constant 0 : index
    %c0_4 = arith.constant 0 : index
    %c0_5 = arith.constant 0 : index
    %c0_6 = arith.constant 0 : index
    %2 = vector.load %arg1[%c0_3, %c0_4, %c0_5, %c0_6] : memref<1x9x9x3xf32, #tpu.memory_space<vmem>>, vector<1x8x8x3xf32>
    %3 = vector.shape_cast %2 : vector<1x8x8x3xf32> to vector<8x8x3xf32>
    %4 = vector.shape_cast %3 : vector<8x8x3xf32> to vector<64x3xf32>
    %5 = arith.truncf %4 : vector<64x3xf32> to vector<64x3xbf16>
    %c0_7 = arith.constant 0 : index
    %c0_8 = arith.constant 0 : index
    %c0_9 = arith.constant 0 : index
    %6 = vector.load %arg5[%c0_7, %c0_8, %c0_9] : memref<9x3x16xbf16, #tpu.memory_space<vmem>>, vector<1x3x16xbf16>
    %7 = vector.shape_cast %6 : vector<1x3x16xbf16> to vector<3x16xbf16>
    %cst = arith.constant dense<0.000000e+00> : vector<64x16xf32>
    %8 = tpu.matmul %5, %7, %cst {dimension_numbers = #tpu.dot_dimension_numbers<[1], [0], [0], [1], [0, 0, 1, 1], [], []>} : vector<64x3xbf16>, vector<3x16xbf16>, vector<64x16xf32> -> vector<64x16xf32>
    %c0_10 = arith.constant 0 : index
    %c0_11 = arith.constant 0 : index
    %c0_12 = arith.constant 0 : index
    %c0_13 = arith.constant 0 : index
    %9 = vector.load %arg2[%c0_10, %c0_11, %c0_12, %c0_13] : memref<1x9x9x3xf32, #tpu.memory_space<vmem>>, vector<1x8x8x3xf32>
    %10 = vector.shape_cast %9 : vector<1x8x8x3xf32> to vector<8x8x3xf32>
    %11 = vector.shape_cast %10 : vector<8x8x3xf32> to vector<64x3xf32>
    %12 = arith.truncf %11 : vector<64x3xf32> to vector<64x3xbf16>
    %c1 = arith.constant 1 : index
    %c0_14 = arith.constant 0 : index
    %c0_15 = arith.constant 0 : index
    %13 = vector.load %arg5[%c1, %c0_14, %c0_15] : memref<9x3x16xbf16, #tpu.memory_space<vmem>>, vector<1x3x16xbf16>
    %14 = vector.shape_cast %13 : vector<1x3x16xbf16> to vector<3x16xbf16>
    %cst_16 = arith.constant dense<0.000000e+00> : vector<64x16xf32>
    %15 = tpu.matmul %12, %14, %cst_16 {dimension_numbers = #tpu.dot_dimension_numbers<[1], [0], [0], [1], [0, 0, 1, 1], [], []>} : vector<64x3xbf16>, vector<3x16xbf16>, vector<64x16xf32> -> vector<64x16xf32>
    %16 = arith.addf %8, %15 : vector<64x16xf32>
    %c0_17 = arith.constant 0 : index
    %c0_18 = arith.constant 0 : index
    %c1_19 = arith.constant 1 : index
    %c0_20 = arith.constant 0 : index
    %17 = vector.load %arg1[%c0_17, %c0_18, %c1_19, %c0_20] : memref<1x9x9x3xf32, #tpu.memory_space<vmem>>, vector<1x8x8x3xf32>
    %18 = vector.shape_cast %17 : vector<1x8x8x3xf32> to vector<8x8x3xf32>
    %19 = vector.shape_cast %18 : vector<8x8x3xf32> to vector<64x3xf32>
    %20 = arith.truncf %19 : vector<64x3xf32> to vector<64x3xbf16>
    %c2 = arith.constant 2 : index
    %c0_21 = arith.constant 0 : index
    %c0_22 = arith.constant 0 : index
    %21 = vector.load %arg5[%c2, %c0_21, %c0_22] : memref<9x3x16xbf16, #tpu.memory_space<vmem>>, vector<1x3x16xbf16>
    %22 = vector.shape_cast %21 : vector<1x3x16xbf16> to vector<3x16xbf16>
    %cst_23 = arith.constant dense<0.000000e+00> : vector<64x16xf32>
    %23 = tpu.matmul %20, %22, %cst_23 {dimension_numbers = #tpu.dot_dimension_numbers<[1], [0], [0], [1], [0, 0, 1, 1], [], []>} : vector<64x3xbf16>, vector<3x16xbf16>, vector<64x16xf32> -> vector<64x16xf32>
    %24 = arith.addf %16, %23 : vector<64x16xf32>
    %c0_24 = arith.constant 0 : index
    %c0_25 = arith.constant 0 : index
    %c0_26 = arith.constant 0 : index
    %c0_27 = arith.constant 0 : index
    %25 = vector.load %arg3[%c0_24, %c0_25, %c0_26, %c0_27] : memref<1x9x9x3xf32, #tpu.memory_space<vmem>>, vector<1x8x8x3xf32>
    %26 = vector.shape_cast %25 : vector<1x8x8x3xf32> to vector<8x8x3xf32>
    %27 = vector.shape_cast %26 : vector<8x8x3xf32> to vector<64x3xf32>
    %28 = arith.truncf %27 : vector<64x3xf32> to vector<64x3xbf16>
    %c3 = arith.constant 3 : index
    %c0_28 = arith.constant 0 : index
    %c0_29 = arith.constant 0 : index
    %29 = vector.load %arg5[%c3, %c0_28, %c0_29] : memref<9x3x16xbf16, #tpu.memory_space<vmem>>, vector<1x3x16xbf16>
    %30 = vector.shape_cast %29 : vector<1x3x16xbf16> to vector<3x16xbf16>
    %cst_30 = arith.constant dense<0.000000e+00> : vector<64x16xf32>
    %31 = tpu.matmul %28, %30, %cst_30 {dimension_numbers = #tpu.dot_dimension_numbers<[1], [0], [0], [1], [0, 0, 1, 1], [], []>} : vector<64x3xbf16>, vector<3x16xbf16>, vector<64x16xf32> -> vector<64x16xf32>
    %32 = arith.addf %24, %31 : vector<64x16xf32>
    %c0_31 = arith.constant 0 : index
    %c0_32 = arith.constant 0 : index
    %c0_33 = arith.constant 0 : index
    %c0_34 = arith.constant 0 : index
    %33 = vector.load %arg4[%c0_31, %c0_32, %c0_33, %c0_34] : memref<1x9x9x3xf32, #tpu.memory_space<vmem>>, vector<1x8x8x3xf32>
    %34 = vector.shape_cast %33 : vector<1x8x8x3xf32> to vector<8x8x3xf32>
    %35 = vector.shape_cast %34 : vector<8x8x3xf32> to vector<64x3xf32>
    %36 = arith.truncf %35 : vector<64x3xf32> to vector<64x3xbf16>
    %c4 = arith.constant 4 : index
    %c0_35 = arith.constant 0 : index
    %c0_36 = arith.constant 0 : index
    %37 = vector.load %arg5[%c4, %c0_35, %c0_36] : memref<9x3x16xbf16, #tpu.memory_space<vmem>>, vector<1x3x16xbf16>
    %38 = vector.shape_cast %37 : vector<1x3x16xbf16> to vector<3x16xbf16>
    %cst_37 = arith.constant dense<0.000000e+00> : vector<64x16xf32>
    %39 = tpu.matmul %36, %38, %cst_37 {dimension_numbers = #tpu.dot_dimension_numbers<[1], [0], [0], [1], [0, 0, 1, 1], [], []>} : vector<64x3xbf16>, vector<3x16xbf16>, vector<64x16xf32> -> vector<64x16xf32>
    %40 = arith.addf %32, %39 : vector<64x16xf32>
    %c0_38 = arith.constant 0 : index
    %c0_39 = arith.constant 0 : index
    %c1_40 = arith.constant 1 : index
    %c0_41 = arith.constant 0 : index
    %41 = vector.load %arg3[%c0_38, %c0_39, %c1_40, %c0_41] : memref<1x9x9x3xf32, #tpu.memory_space<vmem>>, vector<1x8x8x3xf32>
    %42 = vector.shape_cast %41 : vector<1x8x8x3xf32> to vector<8x8x3xf32>
    %43 = vector.shape_cast %42 : vector<8x8x3xf32> to vector<64x3xf32>
    %44 = arith.truncf %43 : vector<64x3xf32> to vector<64x3xbf16>
    %c5 = arith.constant 5 : index
    %c0_42 = arith.constant 0 : index
    %c0_43 = arith.constant 0 : index
    %45 = vector.load %arg5[%c5, %c0_42, %c0_43] : memref<9x3x16xbf16, #tpu.memory_space<vmem>>, vector<1x3x16xbf16>
    %46 = vector.shape_cast %45 : vector<1x3x16xbf16> to vector<3x16xbf16>
    %cst_44 = arith.constant dense<0.000000e+00> : vector<64x16xf32>
    %47 = tpu.matmul %44, %46, %cst_44 {dimension_numbers = #tpu.dot_dimension_numbers<[1], [0], [0], [1], [0, 0, 1, 1], [], []>} : vector<64x3xbf16>, vector<3x16xbf16>, vector<64x16xf32> -> vector<64x16xf32>
    %48 = arith.addf %40, %47 : vector<64x16xf32>
    %c0_45 = arith.constant 0 : index
    %c1_46 = arith.constant 1 : index
    %c0_47 = arith.constant 0 : index
    %c0_48 = arith.constant 0 : index
    %49 = vector.load %arg1[%c0_45, %c1_46, %c0_47, %c0_48] : memref<1x9x9x3xf32, #tpu.memory_space<vmem>>, vector<1x8x8x3xf32>
    %50 = vector.shape_cast %49 : vector<1x8x8x3xf32> to vector<8x8x3xf32>
    %51 = vector.shape_cast %50 : vector<8x8x3xf32> to vector<64x3xf32>
    %52 = arith.truncf %51 : vector<64x3xf32> to vector<64x3xbf16>
    %c6 = arith.constant 6 : index
    %c0_49 = arith.constant 0 : index
    %c0_50 = arith.constant 0 : index
    %53 = vector.load %arg5[%c6, %c0_49, %c0_50] : memref<9x3x16xbf16, #tpu.memory_space<vmem>>, vector<1x3x16xbf16>
    %54 = vector.shape_cast %53 : vector<1x3x16xbf16> to vector<3x16xbf16>
    %cst_51 = arith.constant dense<0.000000e+00> : vector<64x16xf32>
    %55 = tpu.matmul %52, %54, %cst_51 {dimension_numbers = #tpu.dot_dimension_numbers<[1], [0], [0], [1], [0, 0, 1, 1], [], []>} : vector<64x3xbf16>, vector<3x16xbf16>, vector<64x16xf32> -> vector<64x16xf32>
    %56 = arith.addf %48, %55 : vector<64x16xf32>
    %c0_52 = arith.constant 0 : index
    %c1_53 = arith.constant 1 : index
    %c0_54 = arith.constant 0 : index
    %c0_55 = arith.constant 0 : index
    %57 = vector.load %arg2[%c0_52, %c1_53, %c0_54, %c0_55] : memref<1x9x9x3xf32, #tpu.memory_space<vmem>>, vector<1x8x8x3xf32>
    %58 = vector.shape_cast %57 : vector<1x8x8x3xf32> to vector<8x8x3xf32>
    %59 = vector.shape_cast %58 : vector<8x8x3xf32> to vector<64x3xf32>
    %60 = arith.truncf %59 : vector<64x3xf32> to vector<64x3xbf16>
    %c7 = arith.constant 7 : index
    %c0_56 = arith.constant 0 : index
    %c0_57 = arith.constant 0 : index
    %61 = vector.load %arg5[%c7, %c0_56, %c0_57] : memref<9x3x16xbf16, #tpu.memory_space<vmem>>, vector<1x3x16xbf16>
    %62 = vector.shape_cast %61 : vector<1x3x16xbf16> to vector<3x16xbf16>
    %cst_58 = arith.constant dense<0.000000e+00> : vector<64x16xf32>
    %63 = tpu.matmul %60, %62, %cst_58 {dimension_numbers = #tpu.dot_dimension_numbers<[1], [0], [0], [1], [0, 0, 1, 1], [], []>} : vector<64x3xbf16>, vector<3x16xbf16>, vector<64x16xf32> -> vector<64x16xf32>
    %64 = arith.addf %56, %63 : vector<64x16xf32>
    %c0_59 = arith.constant 0 : index
    %c1_60 = arith.constant 1 : index
    %c1_61 = arith.constant 1 : index
    %c0_62 = arith.constant 0 : index
    %65 = vector.load %arg1[%c0_59, %c1_60, %c1_61, %c0_62] : memref<1x9x9x3xf32, #tpu.memory_space<vmem>>, vector<1x8x8x3xf32>
    %66 = vector.shape_cast %65 : vector<1x8x8x3xf32> to vector<8x8x3xf32>
    %67 = vector.shape_cast %66 : vector<8x8x3xf32> to vector<64x3xf32>
    %68 = arith.truncf %67 : vector<64x3xf32> to vector<64x3xbf16>
    %c8 = arith.constant 8 : index
    %c0_63 = arith.constant 0 : index
    %c0_64 = arith.constant 0 : index
    %69 = vector.load %arg5[%c8, %c0_63, %c0_64] : memref<9x3x16xbf16, #tpu.memory_space<vmem>>, vector<1x3x16xbf16>
    %70 = vector.shape_cast %69 : vector<1x3x16xbf16> to vector<3x16xbf16>
    %cst_65 = arith.constant dense<0.000000e+00> : vector<64x16xf32>
    %71 = tpu.matmul %68, %70, %cst_65 {dimension_numbers = #tpu.dot_dimension_numbers<[1], [0], [0], [1], [0, 0, 1, 1], [], []>} : vector<64x3xbf16>, vector<3x16xbf16>, vector<64x16xf32> -> vector<64x16xf32>
    %72 = arith.addf %64, %71 : vector<64x16xf32>
    %c0_66 = arith.constant 0 : index
    %c0_67 = arith.constant 0 : index
    %c0_68 = arith.constant 0 : index
    %73 = vector.load %arg8[%c0_66, %c0_67, %c0_68] : memref<1x64x16xf32, #tpu.memory_space<vmem>>, vector<1x64x16xf32>
    %74 = vector.shape_cast %73 : vector<1x64x16xf32> to vector<64x16xf32>
    %75 = vector.shape_cast %72 : vector<64x16xf32> to vector<1x64x16xf32>
    tpu.vector_store %arg8[%c0_66, %c0_67, %c0_68], %75 {strides = array<i32>} : memref<1x64x16xf32, #tpu.memory_space<vmem>>, vector<1x64x16xf32>,
    %76 = vector.broadcast %0 : vector<1x16xf32> to vector<64x16xf32>
    %77 = arith.mulf %72, %76 : vector<64x16xf32>
    %78 = vector.broadcast %1 : vector<1x16xf32> to vector<64x16xf32>
    %79 = arith.addf %77, %78 : vector<64x16xf32>
    %c0_69 = arith.constant 0 : index
    %c0_70 = arith.constant 0 : index
    %c0_71 = arith.constant 0 : index
    %80 = vector.load %arg9[%c0_69, %c0_70, %c0_71] : memref<1x64x16xf32, #tpu.memory_space<vmem>>, vector<1x64x16xf32>
    %81 = vector.shape_cast %80 : vector<1x64x16xf32> to vector<64x16xf32>
    %82 = vector.shape_cast %79 : vector<64x16xf32> to vector<1x64x16xf32>
    tpu.vector_store %arg9[%c0_69, %c0_70, %c0_71], %82 {strides = array<i32>} : memref<1x64x16xf32, #tpu.memory_space<vmem>>, vector<1x64x16xf32>,
    %83 = arith.negf %79 : vector<64x16xf32>
    %84 = math.exp %83 : vector<64x16xf32>
    %cst_72 = arith.constant 1.000000e+00 : f32
    %85 = vector.broadcast %cst_72 : f32 to vector<64x16xf32>
    %86 = arith.addf %85, %84 : vector<64x16xf32>
    %87 = arith.divf %85, %86 : vector<64x16xf32>
    %88 = arith.mulf %79, %87 : vector<64x16xf32>
    %c0_73 = arith.constant 0 : index
    %c0_74 = arith.constant 0 : index
    %c0_75 = arith.constant 0 : index
    %89 = vector.load %arg10[%c0_73, %c0_74, %c0_75] : memref<1x64x16xf32, #tpu.memory_space<vmem>>, vector<1x64x16xf32>
    %90 = vector.shape_cast %89 : vector<1x64x16xf32> to vector<64x16xf32>
    %91 = vector.shape_cast %88 : vector<64x16xf32> to vector<1x64x16xf32>
    tpu.vector_store %arg10[%c0_73, %c0_74, %c0_75], %91 {strides = array<i32>} : memref<1x64x16xf32, #tpu.memory_space<vmem>>, vector<1x64x16xf32>,
    return
  }
  func.func @transform_0(%arg0: i32) -> (i32, i32, i32, i32) {
    %c0_i32 = arith.constant 0 : i32
    %c0_i32_0 = arith.constant 0 : i32
    %c0_i32_1 = arith.constant 0 : i32
    %c0_i32_2 = arith.constant 0 : i32
    return %arg0, %c0_i32, %c0_i32_0, %c0_i32_1 : i32, i32, i32, i32
  }
  func.func @transform_1(%arg0: i32) -> (i32, i32, i32, i32) {
    %c0_i32 = arith.constant 0 : i32
    %c0_i32_0 = arith.constant 0 : i32
    %c0_i32_1 = arith.constant 0 : i32
    %c0_i32_2 = arith.constant 0 : i32
    return %arg0, %c0_i32, %c0_i32_0, %c0_i32_1 : i32, i32, i32, i32
  }
  func.func @transform_2(%arg0: i32) -> (i32, i32, i32, i32) {
    %c0_i32 = arith.constant 0 : i32
    %c0_i32_0 = arith.constant 0 : i32
    %c0_i32_1 = arith.constant 0 : i32
    %c0_i32_2 = arith.constant 0 : i32
    return %arg0, %c0_i32, %c0_i32_0, %c0_i32_1 : i32, i32, i32, i32
  }
  func.func @transform_3(%arg0: i32) -> (i32, i32, i32, i32) {
    %c0_i32 = arith.constant 0 : i32
    %c0_i32_0 = arith.constant 0 : i32
    %c0_i32_1 = arith.constant 0 : i32
    %c0_i32_2 = arith.constant 0 : i32
    return %arg0, %c0_i32, %c0_i32_0, %c0_i32_1 : i32, i32, i32, i32
  }
  func.func @transform_4(%arg0: i32) -> (i32, i32, i32) {
    %c0_i32 = arith.constant 0 : i32
    %c0_i32_0 = arith.constant 0 : i32
    %c0_i32_1 = arith.constant 0 : i32
    %c0_i32_2 = arith.constant 0 : i32
    return %c0_i32, %c0_i32_0, %c0_i32_1 : i32, i32, i32
  }
  func.func @transform_5(%arg0: i32) -> (i32, i32) {
    %c0_i32 = arith.constant 0 : i32
    %c0_i32_0 = arith.constant 0 : i32
    %c0_i32_1 = arith.constant 0 : i32
    return %c0_i32, %c0_i32_0 : i32, i32
  }
  func.func @transform_6(%arg0: i32) -> (i32, i32) {
    %c0_i32 = arith.constant 0 : i32
    %c0_i32_0 = arith.constant 0 : i32
    %c0_i32_1 = arith.constant 0 : i32
    return %c0_i32, %c0_i32_0 : i32, i32
  }
  func.func @transform_7(%arg0: i32) -> (i32, i32, i32) {
    %c0_i32 = arith.constant 0 : i32
    %c0_i32_0 = arith.constant 0 : i32
    %c0_i32_1 = arith.constant 0 : i32
    return %arg0, %c0_i32, %c0_i32_0 : i32, i32, i32
  }
  func.func @transform_8(%arg0: i32) -> (i32, i32, i32) {
    %c0_i32 = arith.constant 0 : i32
    %c0_i32_0 = arith.constant 0 : i32
    %c0_i32_1 = arith.constant 0 : i32
    return %arg0, %c0_i32, %c0_i32_0 : i32, i32, i32
  }
  func.func @transform_9(%arg0: i32) -> (i32, i32, i32) {
    %c0_i32 = arith.constant 0 : i32
    %c0_i32_0 = arith.constant 0 : i32
    %c0_i32_1 = arith.constant 0 : i32
    return %arg0, %c0_i32, %c0_i32_0 : i32, i32, i32
  }
}

</mosaic_0001>

<bundles_post_ra>
// kernel: tpu_custom_call.1
= control target key start
LH: loop header
LB: loop body
LE: loop exit
PB: predicated region body
PF: predicated region fallthrough
CT: control target
= control target key end

     0   :  { %s1569_s30 = smov 0   ;;  %s1999_s0 = inlined_call_operand.vmem [shape: f32[2,9,9,3], index: 0, kind: input, shape index: {}]   ;;  %s2000_s1 = inlined_call_operand.vmem [shape: f32[2,9,9,3], index: 1, kind: input, shape index: {}]   ;;  %s2001_s2 = inlined_call_operand.vmem [shape: f32[2,9,9,3], index: 2, kind: input, shape index: {}]   ;;  %s2002_s3 = inlined_call_operand.vmem [shape: f32[2,9,9,3], index: 3, kind: input, shape index: {}]   ;;  %s2003_s4 = inlined_call_operand.vmem [shape: bf16[9,3,16], index: 4, kind: input, shape index: {}]   ;;  %s2004_s5 = inlined_call_operand.vmem [shape: f32[1,16], index: 5, kind: input, shape index: {}]   ;;  %s2005_s6 = inlined_call_operand.vmem [shape: f32[1,16], index: 6, kind: input, shape index: {}]   ;;  %s2006_s7 = inlined_call_operand.vmem [shape: f32[2,64,16], index: 7, kind: output, shape index: {0}]   ;;  %s2007_s8 = inlined_call_operand.vmem [shape: f32[2,64,16], index: 8, kind: output, shape index: {1}]   ;;  %s2008_s9 = inlined_call_operand.vmem [shape: f32[2,64,16], index: 9, kind: output, shape index: {2}]  }
   0x1 LB: > { %s1369_s10 = sadd.s32 4294967295, %s1516_s30   ;;  %p1373_p0 = scmp.ge.s32.totalorder %s1516_s30, 1  ;;  %s1516_s30 = sphi %s1569_s30, %s20_s30  }
   0x2   : > { %p322_p1 = scmp.lt.s32.totalorder %s1516_s30, 3 }
   0x4   : > { %p323_p2 = pnand %p1373_p0, %p322_p1 }
   0x5   : > { %p383_p3 = scmp.lt.s32.totalorder (!%p323_p2), %s1369_s10, 1 }
   0x6   : > { %326 = sbr.rel (%p323_p2) target bundleno = 331 (0x14b), region = 48 }
   0xb   : > { %v1384_v0 = vld [vmem:[%s2003_s4 + $0x2] sm:$0x3]  ;;  %vm461_vm0 = vcmask 1040384   ;;  %vm462_vm1 = vcmask 1041408   ;;  %v1518_v1 = vmov 65535   ;;  %s2010_s10 = smov (!%p383_p3, %s1369_s10), 1 }
   0xc   : > { %v463_v2 = vsel %vm461_vm0, 4294967295, %v1518_v1  ;;  %v1393_v3 = vld [vmem:[%s2003_s4 + $0x4] sm:$0x3]  ;;  %v1398_v4 = vld [vmem:[%s2003_s4 + $0x6] sm:$0x3]  ;;  %s1595_s21 = smul.u32 144, %s2010_s10 }
   0xd   : > { %v464_v5 = vsel %vm462_vm1, %v463_v2, 0  ;;  %v433_v6 = vld [vmem:[%s2003_s4] sm:$0x3]  ;;  %v1403_v7 = vld [vmem:[%s2003_s4 + $0x8] sm:$0x3]  ;;  %vm448_vm2 = vcmask 23552  }
   0xe   : > { %v466_v8 = vand.u32 %v1384_v0, %v464_v5  ;;  %v568_v9 = vand.u32 %v1393_v3, %v464_v5  ;;  %v634_v10 = vand.u32 %v1398_v4, %v464_v5  ;;  %v510_v11 = vand.u32 %v464_v5, %v433_v6  ;;  %v1421_v13 = vld [vmem:[%s2003_s4 + $0xc] sm:$0x3]  ;;  %s1604_s26 = scalar_lea.vmem %s2000_s1, %s1595_s21  ;;  %v1434_v14 = vld [vmem:[%s2003_s4 + $0xe] sm:$0x3]  ;;  %v1408_v15 = vld [vmem:[%s2003_s4 + $0xa] sm:$0x3]  ;;  %s1652_s16 = scalar_lea.vmem %s1999_s0, %s1595_s21 }
   0xf   : > { %v700_v12 = vand.u32 %v1403_v7, %v464_v5  ;;  %v1447_v16 = vld [vmem:[%s2003_s4 + $0x10] sm:$0x3]  ;;  %v1616_v17 = vld [vmem:[%s1604_s26 + $0x20] sm:$0xff]  ;;  %v833_v24 = vand.u32 %v1421_v13, %v464_v5  ;;  %v900_v29 = vand.u32 %v1434_v14, %v464_v5  ;;  %v766_v30 = vand.u32 %v1408_v15, %v464_v5  ;;  %s1658_s19 = scalar_lea.vmem %s2001_s2, %s1595_s21  ;;  %s1664_s23 = scalar_lea.vmem %s2002_s3, %s1595_s21 }
  0x10   : > { %1465 = vmatpush.bf16.msra.mxu1 %v466_v8  ;;  %1466 = vmatpush.bf16.msra.mxu2 %v466_v8  ;;  %v1619_v18 = vld [vmem:[%s1604_s26 + $0x30] sm:$0xff]  ;;  %v1622_v19 = vld [vmem:[%s1604_s26 + $0x40] sm:$0xff]  ;;  %v966_v32 = vand.u32 %v1447_v16, %v464_v5  ;;  %s1818_s25 = sshll.u32 %s2010_s10, 6  ;;  %vm1005_vm3 = vcmask 130048  }
  0x11   : > { %1467 = vmatpush.bf16.msra.mxu3 %v466_v8  ;;  %475 = vmatpush.bf16.msra.mxu0 %v466_v8  ;;  %v443_v20 = vpack.c.bf16 %v1619_v18, %v1616_v17  ;;  %v1627_v21 = vld [vmem:[%s1604_s26 + $0x50] sm:$0xff]  ;;  %v1630_v22 = vld [vmem:[%s1604_s26 + $0x60] sm:$0xff]  ;;  %s1830_s11 = scalar_lea.vmem %s2006_s7, %s1818_s25  ;;  %s1841_s13 = scalar_lea.vmem %s2007_s8, %s1818_s25 }
  0x12   : > { %v1633_v23 = vld [vmem:[%s1604_s26 + $0x70] sm:$0xff]  ;;  %v444_v25 = vpack.c.bf16 %v1627_v21, %v1622_v19  ;;  %v434_v27 = vld [vmem:[%s1604_s26] sm:$0xff] }
  0x13   : > { %v445_v26 = vpack.c.bf16 %v1633_v23, %v1630_v22  ;;  %v1641_v28 = vld [vmem:[%s1604_s26 + $0x10] sm:$0xff]  ;;  %1386 = vmatmul.msk.bf16.vlgmr.msra.gmra.mxu1 %vm448_vm2, %v443_v20  ;;  %v421_v33 = vld [vmem:[%s1652_s16] sm:$0xff] }
  0x14   : > { %577 = vmatpush.bf16.msrb.mxu2 %v568_v9  ;;  %519 = vmatpush.bf16.msrb.mxu1 %v510_v11  ;;  %v442_v31 = vpack.c.bf16 %v1641_v28, %v434_v27  ;;  %v1668_v34 = vld [vmem:[%s1652_s16 + $0x10] sm:$0xff]  ;;  %v541_v35 = vld [vmem:[%s1652_s16 + $0x1] sm:$0xff]  ;;  %v881_v5 = vpack.c.bf16 %v1616_v17, %v1641_v28 }
  0x15   : > { %643 = vmatpush.bf16.msrb.mxu3 %v634_v10  ;;  %709 = vmatpush.bf16.msrb.mxu0 %v700_v12  ;;  %v1672_v36 = vld [vmem:[%s1652_s16 + $0x11] sm:$0xff]  ;;  %v607_v37 = vld [vmem:[%s1658_s19] sm:$0xff]  ;;  %v429_v41 = vpack.c.bf16 %v1668_v34, %v421_v33 }
  0x16   : > { %1387 = vmatmul.msk.bf16.vlgmr.msra.gmra.mxu2 %vm448_vm2, %v444_v25  ;;  %1388 = vmatmul.msk.bf16.vlgmr.msra.gmra.mxu3 %vm448_vm2, %v445_v26  ;;  %v608_v38 = vld [vmem:[%s1658_s19 + $0x10] sm:$0xff]  ;;  %v673_v39 = vld [vmem:[%s1664_s23] sm:$0xff]  ;;  %v549_v42 = vpack.c.bf16 %v1672_v36, %v541_v35 }
  0x17   : > { %1385 = vmatmul.msk.bf16.vlgmr.msra.gmra.mxu0 %vm448_vm2, %v442_v31  ;;  %v674_v40 = vld [vmem:[%s1664_s23 + $0x10] sm:$0xff]  ;;  %v615_v43 = vpack.c.bf16 %v608_v38, %v607_v37  ;;  %v423_v45 = vld [vmem:[%s1652_s16 + $0x20] sm:$0xff] }
  0x18   : > { %842 = vmatpush.bf16.msra.mxu2 %v833_v24  ;;  %775 = vmatpush.bf16.msra.mxu1 %v766_v30  ;;  %v681_v44 = vpack.c.bf16 %v674_v40, %v673_v39  ;;  %v1686_v46 = vld [vmem:[%s1652_s16 + $0x30] sm:$0xff]  ;;  %v543_v47 = vld [vmem:[%s1652_s16 + $0x21] sm:$0xff]  ;;  %v814_v26 = vpack.c.bf16 %v423_v45, %v1668_v34 }
  0x19   : > { %909 = vmatpush.bf16.msra.mxu3 %v900_v29  ;;  %975 = vmatpush.bf16.msra.mxu0 %v966_v32  ;;  %v1690_v48 = vld [vmem:[%s1652_s16 + $0x31] sm:$0xff]  ;;  %v609_v49 = vld [vmem:[%s1658_s19 + $0x20] sm:$0xff]  ;;  %v430_v53 = vpack.c.bf16 %v1686_v46, %v423_v45  ;;  %v947_v27 = vpack.c.bf16 %v543_v47, %v1672_v36  ;;  %v882_v32 = vpack.c.bf16 %v1622_v19, %v1619_v18 }
  0x1a   : > { %v610_v50 = vld [vmem:[%s1658_s19 + $0x30] sm:$0xff]  ;;  %v675_v51 = vld [vmem:[%s1664_s23 + $0x20] sm:$0xff]  ;;  %v550_v54 = vpack.c.bf16 %v1690_v48, %v543_v47  ;;  %v883_v18 = vpack.c.bf16 %v1630_v22, %v1627_v21 }
  0x1b   : > { %v676_v52 = vld [vmem:[%s1664_s23 + $0x30] sm:$0xff]  ;;  %v616_v55 = vpack.c.bf16 %v610_v50, %v609_v49  ;;  %v425_v57 = vld [vmem:[%s1652_s16 + $0x40] sm:$0xff] }
  0x1c   : > { %v682_v56 = vpack.c.bf16 %v676_v52, %v675_v51  ;;  %v426_v58 = vld [vmem:[%s1652_s16 + $0x50] sm:$0xff]  ;;  %v545_v59 = vld [vmem:[%s1652_s16 + $0x41] sm:$0xff]  ;;  %v815_v31 = vpack.c.bf16 %v425_v57, %v1686_v46 }
  0x1d   : > { %v546_v60 = vld [vmem:[%s1652_s16 + $0x51] sm:$0xff]  ;;  %v611_v61 = vld [vmem:[%s1658_s19 + $0x40] sm:$0xff]  ;;  %v431_v1 = vpack.c.bf16 %v426_v58, %v425_v57  ;;  %v948_v33 = vpack.c.bf16 %v545_v59, %v1690_v48 }
  0x1e   : > { %v612_v62 = vld [vmem:[%s1658_s19 + $0x50] sm:$0xff]  ;;  %v677_v63 = vld [vmem:[%s1664_s23 + $0x40] sm:$0xff]  ;;  %v551_v2 = vpack.c.bf16 %v546_v60, %v545_v59 }
  0x1f   : > { %v678_v0 = vld [vmem:[%s1664_s23 + $0x50] sm:$0xff]  ;;  %v617_v3 = vpack.c.bf16 %v612_v62, %v611_v61  ;;  %v427_v6 = vld [vmem:[%s1652_s16 + $0x60] sm:$0xff] }
  0x20   : > { %v683_v4 = vpack.c.bf16 %v678_v0, %v677_v63  ;;  %v428_v7 = vld [vmem:[%s1652_s16 + $0x70] sm:$0xff]  ;;  %v547_v8 = vld [vmem:[%s1652_s16 + $0x61] sm:$0xff]  ;;  %v816_v37 = vpack.c.bf16 %v427_v6, %v426_v58 }
  0x21   : > { %v548_v9 = vld [vmem:[%s1652_s16 + $0x71] sm:$0xff]  ;;  %v613_v10 = vld [vmem:[%s1658_s19 + $0x60] sm:$0xff]  ;;  %v432_v14 = vpack.c.bf16 %v428_v7, %v427_v6  ;;  %v949_v19 = vpack.c.bf16 %v547_v8, %v546_v60 }
  0x22   : > { %v614_v11 = vld [vmem:[%s1658_s19 + $0x70] sm:$0xff]  ;;  %v679_v12 = vld [vmem:[%s1664_s23 + $0x60] sm:$0xff]  ;;  %v552_v15 = vpack.c.bf16 %v548_v9, %v547_v8 }
  0x23   : > { %1389 = vmatmul.msk.bf16.vlgmr.msrb.gmra.mxu1 %vm448_vm2, %v429_v41  ;;  %v680_v13 = vld [vmem:[%s1664_s23 + $0x70] sm:$0xff]  ;;  %v618_v16 = vpack.c.bf16 %v614_v11, %v613_v10  ;;  %v739_v20 = vld [vmem:[%s1658_s19 + $0x1] sm:$0xff] }
  0x24   : > { %v684_v17 = vpack.c.bf16 %v680_v13, %v679_v12  ;;  %v740_v24 = vld [vmem:[%s1658_s19 + $0x11] sm:$0xff]  ;;  %v741_v28 = vld [vmem:[%s1658_s19 + $0x21] sm:$0xff] }
  0x25   : > { %v747_v25 = vpack.c.bf16 %v740_v24, %v739_v20  ;;  %v742_v29 = vld [vmem:[%s1658_s19 + $0x31] sm:$0xff]  ;;  %v743_v34 = vld [vmem:[%s1658_s19 + $0x41] sm:$0xff] }
  0x26   : > { %1394 = vmatmul.msk.bf16.vlgmr.msrb.gmra.mxu2 %vm448_vm2, %v549_v42  ;;  %1399 = vmatmul.msk.bf16.vlgmr.msrb.gmra.mxu3 %vm448_vm2, %v615_v43  ;;  %v748_v30 = vpack.c.bf16 %v742_v29, %v741_v28  ;;  %v744_v35 = vld [vmem:[%s1658_s19 + $0x51] sm:$0xff]  ;;  %v745_v38 = vld [vmem:[%s1658_s19 + $0x61] sm:$0xff] }
  0x27   : > { %1404 = vmatmul.msk.bf16.vlgmr.msrb.gmra.mxu0 %vm448_vm2, %v681_v44  ;;  %v749_v36 = vpack.c.bf16 %v744_v35, %v743_v34  ;;  %v746_v39 = vld [vmem:[%s1658_s19 + $0x71] sm:$0xff]  ;;  %v1420_v40 = vld [vmem:[%s1652_s16 + $0x80] sm:$0xff] }
  0x28   : > { %v1433_v41 = vld [vmem:[%s1604_s26 + $0x80] sm:$0xff]  ;;  %v750_v43 = vpack.c.bf16 %v746_v39, %v745_v38  ;;  %v817_v45 = vpack.c.bf16 %v1420_v40, %v428_v7 }
  0x29   : > { %v1446_v42 = vld [vmem:[%s1652_s16 + $0x81] sm:$0xff]  ;;  %v884_v21 = vpack.c.bf16 %v1433_v41, %v1633_v23  ;;  %v419_v35 = vld [vmem:[%s2004_s5] sm:$0x1]  ;;  %s1908_s16 = scalar_lea.vmem %s2008_s9, %s1818_s25 }
  0x2a   : > { %v950_v22 = vpack.c.bf16 %v1446_v42, %v548_v9  ;;  %v420_v38 = vld [vmem:[%s2005_s6] sm:$0x1]  ;;  %v1824_v41 = vperm.slane %v419_v35, 0 }
  0x33   : > { %1390 = vmatmul.msk.bf16.gmra.mxu1 %vm448_vm2, %v430_v53 }
  0x36   : > { %1395 = vmatmul.msk.bf16.gmra.mxu2 %vm448_vm2, %v550_v54  ;;  %1400 = vmatmul.msk.bf16.gmra.mxu3 %vm448_vm2, %v616_v55 }
  0x37   : > { %1405 = vmatmul.msk.bf16.gmra.mxu0 %vm448_vm2, %v682_v56 }
  0x43   : > { %1391 = vmatmul.msk.bf16.gmra.mxu1 %vm448_vm2, %v431_v1 }
  0x46   : > { %1396 = vmatmul.msk.bf16.gmra.mxu2 %vm448_vm2, %v551_v2  ;;  %1401 = vmatmul.msk.bf16.gmra.mxu3 %vm448_vm2, %v617_v3 }
  0x47   : > { %1406 = vmatmul.msk.bf16.gmra.mxu0 %vm448_vm2, %v683_v4 }
  0x53   : > { %1392 = vmatmul.msk.bf16.gmra.mxu1 %vm448_vm2, %v432_v14 }
  0x56   : > { %1397 = vmatmul.msk.bf16.gmra.mxu2 %vm448_vm2, %v552_v15  ;;  %1402 = vmatmul.msk.bf16.gmra.mxu3 %vm448_vm2, %v618_v16 }
  0x57   : > { %1407 = vmatmul.msk.bf16.gmra.mxu0 %vm448_vm2, %v684_v17 }
  0x63   : > { %1409 = vmatmul.msk.bf16.vlgmr.msra.gmra.mxu1 %vm448_vm2, %v747_v25 }
  0x66   : > { %1422 = vmatmul.msk.bf16.vlgmr.msra.gmra.mxu2 %vm448_vm2, %v814_v26  ;;  %1435 = vmatmul.msk.bf16.vlgmr.msra.gmra.mxu3 %vm448_vm2, %v881_v5 }
  0x67   : > { %1448 = vmatmul.msk.bf16.vlgmr.msra.gmra.mxu0 %vm448_vm2, %v947_v27 }
  0x73   : > { %1410 = vmatmul.msk.bf16.gmra.mxu1 %vm448_vm2, %v748_v30 }
  0x76   : > { %1423 = vmatmul.msk.bf16.gmra.mxu2 %vm448_vm2, %v815_v31  ;;  %1436 = vmatmul.msk.bf16.gmra.mxu3 %vm448_vm2, %v882_v32 }
  0x77   : > { %1449 = vmatmul.msk.bf16.gmra.mxu0 %vm448_vm2, %v948_v33 }
  0x83   : > { %1411 = vmatmul.msk.bf16.gmra.mxu1 %vm448_vm2, %v749_v36 }
  0x86   : > { %1424 = vmatmul.msk.bf16.gmra.mxu2 %vm448_vm2, %v816_v37  ;;  %1437 = vmatmul.msk.bf16.gmra.mxu3 %vm448_vm2, %v883_v18 }
  0x87   : > { %1450 = vmatmul.msk.bf16.gmra.mxu0 %vm448_vm2, %v949_v19 }
  0x90   : > { %v1759_v44 = vpop.f32.mrf.mxu1 }
  0x93   : > { %1412 = vmatmul.msk.bf16.gmra.mxu1 %vm448_vm2, %v750_v43 }
  0x94   : > { %v477_v46 = vpop.f32.mrf.mxu0 }
  0x96   : > { %1425 = vmatmul.msk.bf16.gmra.mxu2 %vm448_vm2, %v817_v45  ;;  %1438 = vmatmul.msk.bf16.gmra.mxu3 %vm448_vm2, %v884_v21  ;;  %v1832_v21 = vperm.slane %v420_v38, 0 }
  0x97   : > { %1451 = vmatmul.msk.bf16.gmra.mxu0 %vm448_vm2, %v950_v22 }
  0x98   : > { %v1770_v49 = vpop.f32.mrf.mxu1 }
  0x99   : > { %v1766_v47 = vpop.f32.mrf.mxu2  ;;  %v1768_v48 = vpop.f32.mrf.mxu3 }
  0x9c   : > { %v479_v50 = vpop.f32.mrf.mxu0 }
  0xa0   : > { %v521_v52 = vpop.f32.mrf.mxu1 }
  0xa1   : > { %v1772_v51 = vpop.f32.mrf.mxu2  ;;  %v1774_v23 = vpop.f32.mrf.mxu3  ;;  %v522_v17 = vadd.f32 %v521_v52, %v477_v46 }
  0xa4   : > { %v711_v53 = vpop.f32.mrf.mxu0 }
  0xa8   : > { %v523_v56 = vpop.f32.mrf.mxu1 }
  0xa9   : > { %v579_v54 = vpop.f32.mrf.mxu2  ;;  %v645_v55 = vpop.f32.mrf.mxu3  ;;  %v524_v29 = vadd.f32 %v523_v56, %v479_v50 }
  0xaa   : > { %v599_v24 = vadd.f32 %v579_v54, %v522_v17 }
  0xac   : > { %v713_v57 = vpop.f32.mrf.mxu0  ;;  %v665_v27 = vadd.f32 %v645_v55, %v599_v24 }
  0xae   : > { %v731_v32 = vadd.f32 %v711_v53, %v665_v27 }
  0xb0   : > { %v526_v60 = vpop.f32.mrf.mxu1 }
  0xb1   : > { %v581_v58 = vpop.f32.mrf.mxu2  ;;  %v647_v59 = vpop.f32.mrf.mxu3  ;;  %v527_v39 = vadd.f32 %v526_v60, %v1759_v44 }
  0xb2   : > { %v600_v31 = vadd.f32 %v581_v58, %v524_v29 }
  0xb4   : > { %v1776_v61 = vpop.f32.mrf.mxu0  ;;  %v666_v37 = vadd.f32 %v647_v59, %v600_v31 }
  0xb6   : > { %v732_v22 = vadd.f32 %v713_v57, %v666_v37 }
  0xb8   : > { %v528_v0 = vpop.f32.mrf.mxu1 }
  0xb9   : > { %v584_v62 = vpop.f32.mrf.mxu2  ;;  %v650_v63 = vpop.f32.mrf.mxu3  ;;  %v529_v57 = vadd.f32 %v528_v0, %v1770_v49 }
  0xba   : > { %v601_v43 = vadd.f32 %v584_v62, %v527_v39 }
  0xbc   : > { %v1778_v1 = vpop.f32.mrf.mxu0  ;;  %v667_v53 = vadd.f32 %v650_v63, %v601_v43 }
  0xbe   : > { %v733_v63 = vadd.f32 %v1776_v61, %v667_v53 }
  0xc0   : > { %v1782_v4 = vpop.f32.mrf.mxu1 }
  0xc1   : > { %v586_v2 = vpop.f32.mrf.mxu2  ;;  %v1780_v3 = vpop.f32.mrf.mxu3 }
  0xc2   : > { %v602_v62 = vadd.f32 %v586_v2, %v529_v57 }
  0xc4   : > { %v1784_v5 = vpop.f32.mrf.mxu0  ;;  %v668_v0 = vadd.f32 %v1780_v3, %v602_v62 }
  0xc6   : > { %v734_v37 = vadd.f32 %v1778_v1, %v668_v0 }
  0xc8   : > { %v1790_v8 = vpop.f32.mrf.mxu1 }
  0xc9   : > { %v1786_v6 = vpop.f32.mrf.mxu2  ;;  %v1788_v7 = vpop.f32.mrf.mxu3 }
  0xcc   : > { %v1792_v9 = vpop.f32.mrf.mxu0 }
  0xd0   : > { %v1798_v12 = vpop.f32.mrf.mxu1 }
  0xd1   : > { %v1794_v10 = vpop.f32.mrf.mxu2  ;;  %v1796_v11 = vpop.f32.mrf.mxu3 }
  0xd4   : > { %v1800_v13 = vpop.f32.mrf.mxu0 }
  0xd8   : > { %v1806_v16 = vpop.f32.mrf.mxu1 }
  0xd9   : > { %v1802_v14 = vpop.f32.mrf.mxu2  ;;  %v1804_v15 = vpop.f32.mrf.mxu3 }
  0xdc   : > { %v1808_v20 = vpop.f32.mrf.mxu0 }
  0xe0   : > { %v777_v28 = vpop.f32.mrf.mxu1 }
  0xe1   : > { %v1810_v25 = vpop.f32.mrf.mxu2  ;;  %v1812_v26 = vpop.f32.mrf.mxu3  ;;  %v797_v33 = vadd.f32 %v777_v28, %v731_v32  ;;  %v532_v32 = vadd.f32 %v1782_v4, %v1766_v47 }
  0xe3   : > { %v603_v3 = vadd.f32 %v1786_v6, %v532_v32 }
  0xe4   : > { %v977_v30 = vpop.f32.mrf.mxu0 }
  0xe5   : > { %v669_v38 = vadd.f32 %v1788_v7, %v603_v3 }
  0xe8   : > { %v779_v19 = vpop.f32.mrf.mxu1 }
  0xe9   : > { %v844_v34 = vpop.f32.mrf.mxu2  ;;  %v911_v36 = vpop.f32.mrf.mxu3  ;;  %v798_v46 = vadd.f32 %v779_v19, %v732_v22 }
  0xea   : > { %v864_v18 = vadd.f32 %v844_v34, %v797_v33 }
  0xec   : > { %v931_v40 = vadd.f32 %v911_v36, %v864_v18  ;;  %v979_v42 = vpop.f32.mrf.mxu0 }
  0xee   : > { %v997_v45 = vadd.f32 %v977_v30, %v931_v40 }
  0xf0   : > { %1006 = vst.msk [vmem:[%s1830_s11] sm:$0xff] %vm1005_vm3, %v997_v45  ;;  %v1017_v44 = vmul.f32 %v1824_v41, %v997_v45  ;;  %v782_v56 = vpop.f32.mrf.mxu1 }
  0xf1   : > { %v846_v50 = vpop.f32.mrf.mxu2  ;;  %v913_v52 = vpop.f32.mrf.mxu3  ;;  %v799_v27 = vadd.f32 %v782_v56, %v733_v63 }
  0xf2   : > { %v1844_v54 = vadd.f32 %v1832_v21, %v1017_v44  ;;  %v865_v55 = vadd.f32 %v846_v50, %v798_v46 }
  0xf4   : > { %1036 = vst.msk [vmem:[%s1841_s13] sm:$0xff] %vm1005_vm3, %v1844_v54  ;;  %v1452_v58 = vmul.f32 -1.442695, %v1844_v54  ;;  %v932_v59 = vadd.f32 %v913_v52, %v865_v55  ;;  %v982_v60 = vpop.f32.mrf.mxu0  ;;  %v735_v52 = vadd.f32 %v1784_v5, %v669_v38 }
  0xf6   : > { %1478 = vpow2.f32 %v1452_v58  ;;  %v998_v17 = vadd.f32 %v979_v42, %v932_v59  ;;  %v534_v42 = vadd.f32 %v1790_v8, %v1772_v51 }
  0xf8   : > { %1007 = vst.msk [vmem:[%s1830_s11 + $0x8] sm:$0xff] %vm1005_vm3, %v998_v17  ;;  %v1018_v24 = vmul.f32 %v1824_v41, %v998_v17  ;;  %v784_v31 = vpop.f32.mrf.mxu1  ;;  %v604_v44 = vadd.f32 %v1794_v10, %v534_v42  ;;  %v537_v10 = vadd.f32 %v1798_v12, %v1768_v48 }
  0xf9   : > { %v849_v28 = vpop.f32.mrf.mxu2  ;;  %v916_v49 = vpop.f32.mrf.mxu3  ;;  %v800_v4 = vadd.f32 %v784_v31, %v734_v37 }
  0xfa   : > { %v1857_v29 = vadd.f32 %v1832_v21, %v1018_v24  ;;  %v866_v30 = vadd.f32 %v849_v28, %v799_v27  ;;  %v670_v56 = vadd.f32 %v1796_v11, %v604_v44  ;;  %v605_v24 = vadd.f32 %v1802_v14, %v537_v10 }
  0xfc   : > { %v1479_v2 = vpop.eup %1478  ;;  %1037 = vst.msk [vmem:[%s1841_s13 + $0x8] sm:$0xff] %vm1005_vm3, %v1857_v29  ;;  %v1453_v61 = vmul.f32 -1.442695, %v1857_v29  ;;  %v933_v33 = vadd.f32 %v916_v49, %v866_v30  ;;  %v984_v34 = vpop.f32.mrf.mxu0  ;;  %v736_v30 = vadd.f32 %v1792_v9, %v670_v56 }
  0xfd   : > { %v1068_v35 = vadd.f32 1.0, %v1479_v2  ;;  %v671_v2 = vadd.f32 %v1804_v15, %v605_v24 }
  0xfe   : > { %1480 = vpow2.f32 %v1453_v61  ;;  %v999_v36 = vadd.f32 %v982_v60, %v933_v33 }
  0xff   : > { %1482 = vrcp.f32 %v1068_v35  ;;  %v1085_v57 = vand.u32 2147483647, %v1068_v35  ;;  %v1087_v58 = vand.u32 2147483648, %v1068_v35  ;;  %vm1081_vm5 = vweird.f32 %v1068_v35 }
 0x100   : > { %1008 = vst.msk [vmem:[%s1830_s11 + $0x10] sm:$0xff] %vm1005_vm3, %v999_v36  ;;  %v1019_v47 = vmul.f32 %v1824_v41, %v999_v36  ;;  %v787_v6 = vpop.f32.mrf.mxu1  ;;  %v737_v42 = vadd.f32 %v1800_v13, %v671_v2 }
 0x101   : > { %v851_v18 = vpop.f32.mrf.mxu2  ;;  %v918_v19 = vpop.f32.mrf.mxu3  ;;  %v801_v55 = vadd.f32 %v787_v6, %v735_v52  ;;  %v1088_v49 = vor.u32 1.1754944e-38, %v1087_v58  ;;  %vm1086_vm7 = vcmp.eq.f32.partialorder %v1085_v57, 8.507059e+37 }
 0x102   : > { %v1872_v39 = vadd.f32 %v1832_v21, %v1019_v47  ;;  %v867_v40 = vadd.f32 %v851_v18, %v800_v4 }
 0x104   : > { %v1481_v1 = vpop.eup %1480  ;;  %1038 = vst.msk [vmem:[%s1841_s13 + $0x10] sm:$0xff] %vm1005_vm3, %v1872_v39  ;;  %v1454_v43 = vmul.f32 -1.442695, %v1872_v39  ;;  %v934_v45 = vadd.f32 %v918_v19, %v867_v40  ;;  %v987_v53 = vpop.f32.mrf.mxu0 }
 0x105   : > { %v1483_v22 = vpop.eup %1482  ;;  %v1881_v7 = vadd.f32 1.0, %v1481_v1 }
 0x106   : > { %v1077_v46 = vmul.f32 %v1483_v22, %v1068_v35  ;;  %1484 = vpow2.f32 %v1454_v43  ;;  %v1000_v50 = vadd.f32 %v984_v34, %v934_v45  ;;  %vm1082_vm4 = vweird.f32 %v1483_v22 }
 0x107   : > { %1486 = vrcp.f32 %v1881_v7  ;;  %vm1083_vm6 = vmor %vm1081_vm5, %vm1082_vm4  ;;  %v1100_v3 = vand.u32 2147483647, %v1881_v7  ;;  %v1102_v15 = vand.u32 2147483648, %v1881_v7  ;;  %vm1096_vm9 = vweird.f32 %v1881_v7 }
 0x108   : > { %v1078_v51 = vsub.f32 1.0, %v1077_v46  ;;  %1009 = vst.msk [vmem:[%s1830_s11 + $0x18] sm:$0xff] %vm1005_vm3, %v1000_v50  ;;  %v1020_v8 = vmul.f32 %v1824_v41, %v1000_v50  ;;  %v789_v63 = vpop.f32.mrf.mxu1 }
 0x109   : > { %v854_v59 = vpop.f32.mrf.mxu2  ;;  %v921_v60 = vpop.f32.mrf.mxu3  ;;  %v802_v34 = vadd.f32 %v789_v63, %v736_v30  ;;  %v1103_v45 = vor.u32 1.1754944e-38, %v1102_v15  ;;  %vm1101_vm11 = vcmp.eq.f32.partialorder %v1100_v3, 8.507059e+37 }
 0x10a   : > { %v1079_v5 = vmul.f32 %v1483_v22, %v1078_v51  ;;  %v1892_v62 = vadd.f32 %v1832_v21, %v1020_v8  ;;  %v868_v17 = vadd.f32 %v854_v59, %v801_v55 }
 0x10c   : > { %v1485_v27 = vpop.eup %1484  ;;  %v1080_v28 = vadd.f32 %v1483_v22, %v1079_v5  ;;  %1039 = vst.msk [vmem:[%s1841_s13 + $0x18] sm:$0xff] %vm1005_vm3, %v1892_v62  ;;  %v1455_v48 = vmul.f32 -1.442695, %v1892_v62  ;;  %v935_v11 = vadd.f32 %v921_v60, %v868_v17  ;;  %v989_v35 = vpop.f32.mrf.mxu0 }
 0x10d   : > { %v1487_v12 = vpop.eup %1486  ;;  %v1899_v0 = vadd.f32 1.0, %v1485_v27 }
 0x10e   : > { %v1084_v31 = vsel %vm1083_vm6, %v1483_v22, %v1080_v28  ;;  %v1092_v14 = vmul.f32 %v1487_v12, %v1881_v7  ;;  %1488 = vpow2.f32 %v1455_v48  ;;  %v1001_v33 = vadd.f32 %v987_v53, %v935_v11 }
 0x10f   : > { %v1089_v32 = vsel %vm1086_vm7, %v1088_v49, %v1084_v31  ;;  %1490 = vrcp.f32 %v1899_v0  ;;  %vm1097_vm8 = vweird.f32 %v1487_v12  ;;  %v1117_v53 = vand.u32 2147483648, %v1899_v0 }
 0x110   : > { %v1196_v61 = vmul.f32 %v1089_v32, %v1844_v54  ;;  %v1093_v9 = vsub.f32 1.0, %v1092_v14  ;;  %v1021_v4 = vmul.f32 %v1824_v41, %v1001_v33  ;;  %v539_v54 = vadd.f32 %v1806_v16, %v1774_v23  ;;  %1010 = vst.msk [vmem:[%s1830_s11 + $0x20] sm:$0xff] %vm1005_vm3, %v1001_v33  ;;  %v792_v19 = vpop.f32.mrf.mxu1  ;;  %vm1098_vm10 = vmor %vm1096_vm9, %vm1097_vm8 }
 0x111   : > { %v856_v36 = vpop.f32.mrf.mxu2  ;;  %v923_v37 = vpop.f32.mrf.mxu3  ;;  %v803_v50 = vadd.f32 %v792_v19, %v737_v42  ;;  %v1115_v10 = vand.u32 2147483647, %v1899_v0  ;;  %vm1111_vm13 = vweird.f32 %v1899_v0  ;;  %v1118_v5 = vor.u32 1.1754944e-38, %v1117_v53 }
 0x112   : > { %1204 = vst.msk [vmem:[%s1908_s16] sm:$0xff] %vm1005_vm3, %v1196_v61  ;;  %v1094_v47 = vmul.f32 %v1487_v12, %v1093_v9  ;;  %v869_v18 = vadd.f32 %v856_v36, %v802_v34  ;;  %v1923_v6 = vadd.f32 %v1832_v21, %v1021_v4  ;;  %v606_v43 = vadd.f32 %v1810_v25, %v539_v54 }
 0x113   : > { %vm1116_vm15 = vcmp.eq.f32.partialorder %v1115_v10, 8.507059e+37 }
 0x114   : > { %v1489_v38 = vpop.eup %1488  ;;  %v1095_v40 = vadd.f32 %v1487_v12, %v1094_v47  ;;  %v936_v23 = vadd.f32 %v923_v37, %v869_v18  ;;  %1040 = vst.msk [vmem:[%s1841_s13 + $0x20] sm:$0xff] %vm1005_vm3, %v1923_v6  ;;  %v1456_v7 = vmul.f32 -1.442695, %v1923_v6  ;;  %v672_v52 = vadd.f32 %v1812_v26, %v606_v43  ;;  %v992_v58 = vpop.f32.mrf.mxu0 }
 0x115   : > { %v1491_v1 = vpop.eup %1490  ;;  %v1927_v22 = vadd.f32 1.0, %v1489_v38 }
 0x116   : > { %v1099_v16 = vsel %vm1098_vm10, %v1487_v12, %v1095_v40  ;;  %v1107_v44 = vmul.f32 %v1491_v1, %v1899_v0  ;;  %v1002_v51 = vadd.f32 %v989_v35, %v936_v23  ;;  %vm1112_vm12 = vweird.f32 %v1491_v1 }
 0x117   : > { %v1104_v46 = vsel %vm1101_vm11, %v1103_v45, %v1099_v16  ;;  %1492 = vrcp.f32 %v1927_v22  ;;  %vm1113_vm14 = vmor %vm1111_vm13, %vm1112_vm12  ;;  %v738_v63 = vadd.f32 %v1808_v20, %v672_v52  ;;  %v1130_v2 = vand.u32 2147483647, %v1927_v22 }
 0x118   : > { %v1197_v13 = vmul.f32 %v1104_v46, %v1857_v29  ;;  %v1108_v25 = vsub.f32 1.0, %v1107_v44  ;;  %1494 = vpow2.f32 %v1456_v7  ;;  %1011 = vst.msk [vmem:[%s1830_s11 + $0x28] sm:$0xff] %vm1005_vm3, %v1002_v51  ;;  %v1022_v29 = vmul.f32 %v1824_v41, %v1002_v51  ;;  %v794_v24 = vpop.f32.mrf.mxu1 }
 0x119   : > { %v859_v8 = vpop.f32.mrf.mxu2  ;;  %v926_v55 = vpop.f32.mrf.mxu3  ;;  %v804_v14 = vadd.f32 %v794_v24, %v738_v63  ;;  %v1132_v32 = vand.u32 2147483648, %v1927_v22  ;;  %vm1126_vm1 = vweird.f32 %v1927_v22  ;;  %vm1131_vm4 = vcmp.eq.f32.partialorder %v1130_v2, 8.507059e+37 }
 0x11a   : > { %1205 = vst.msk [vmem:[%s1908_s16 + $0x8] sm:$0xff] %vm1005_vm3, %v1197_v13  ;;  %v1109_v56 = vmul.f32 %v1491_v1, %v1108_v25  ;;  %v870_v57 = vadd.f32 %v859_v8, %v803_v50  ;;  %v1946_v17 = vadd.f32 %v1832_v21, %v1022_v29 }
 0x11b   : > { %v1133_v36 = vor.u32 1.1754944e-38, %v1132_v32 }
 0x11c   : > { %v1110_v59 = vadd.f32 %v1491_v1, %v1109_v56  ;;  %v937_v26 = vadd.f32 %v926_v55, %v870_v57  ;;  %1041 = vst.msk [vmem:[%s1841_s13 + $0x28] sm:$0xff] %vm1005_vm3, %v1946_v17  ;;  %v1457_v0 = vmul.f32 -1.442695, %v1946_v17  ;;  %v994_v37 = vpop.f32.mrf.mxu0 }
 0x11d   : > { %v1493_v60 = vpop.eup %1492 }
 0x11e   : > { %v1495_v27 = vpop.eup %1494  ;;  %v1114_v28 = vsel %vm1113_vm14, %v1491_v1, %v1110_v59  ;;  %v1122_v48 = vmul.f32 %v1493_v60, %v1927_v22  ;;  %v1003_v11 = vadd.f32 %v992_v58, %v937_v26  ;;  %vm1127_vm0 = vweird.f32 %v1493_v60 }
 0x11f   : > { %v1119_v12 = vsel %vm1116_vm15, %v1118_v5, %v1114_v28  ;;  %v1072_v49 = vadd.f32 1.0, %v1495_v27  ;;  %vm1128_vm2 = vmor %vm1126_vm1, %vm1127_vm0 }
 0x120   : > { %v1198_v30 = vmul.f32 %v1119_v12, %v1872_v39  ;;  %v1123_v31 = vsub.f32 1.0, %v1122_v48  ;;  %1012 = vst.msk [vmem:[%s1830_s11 + $0x30] sm:$0xff] %vm1005_vm3, %v1003_v11  ;;  %v1023_v20 = vmul.f32 %v1824_v41, %v1003_v11 }
 0x121   : > { %1496 = vrcp.f32 %v1072_v49  ;;  %v861_v61 = vpop.f32.mrf.mxu2  ;;  %v928_v34 = vpop.f32.mrf.mxu3  ;;  %v1147_v22 = vand.u32 2147483648, %v1072_v49  ;;  %v1145_v44 = vand.u32 2147483647, %v1072_v49  ;;  %vm1141_vm6 = vweird.f32 %v1072_v49 }
 0x122   : > { %1206 = vst.msk [vmem:[%s1908_s16 + $0x10] sm:$0xff] %vm1005_vm3, %v1198_v30  ;;  %v1124_v9 = vmul.f32 %v1493_v60, %v1123_v31  ;;  %1498 = vpow2.f32 %v1457_v0  ;;  %v1963_v39 = vadd.f32 %v1832_v21, %v1023_v20  ;;  %v871_v33 = vadd.f32 %v861_v61, %v804_v14 }
 0x123   : > { %v1148_v46 = vor.u32 1.1754944e-38, %v1147_v22  ;;  %vm1146_vm8 = vcmp.eq.f32.partialorder %v1145_v44, 8.507059e+37 }
 0x124   : > { %v1125_v35 = vadd.f32 %v1493_v60, %v1124_v9  ;;  %1042 = vst.msk [vmem:[%s1841_s13 + $0x30] sm:$0xff] %vm1005_vm3, %v1963_v39  ;;  %v1458_v3 = vmul.f32 -1.442695, %v1963_v39  ;;  %v938_v15 = vadd.f32 %v928_v34, %v871_v33 }
 0x126   : > { %v1129_v47 = vsel %vm1128_vm2, %v1493_v60, %v1125_v35  ;;  %1500 = vpow2.f32 %v1458_v3  ;;  %v1004_v4 = vadd.f32 %v994_v37, %v938_v15 }
 0x127   : > { %v1497_v18 = vpop.eup %1496  ;;  %v1134_v54 = vsel %vm1131_vm4, %v1133_v36, %v1129_v47 }
 0x128   : > { %v1499_v19 = vpop.eup %1498  ;;  %v1199_v38 = vmul.f32 %v1134_v54, %v1892_v62  ;;  %v1137_v40 = vmul.f32 %v1497_v18, %v1072_v49  ;;  %1013 = vst.msk [vmem:[%s1830_s11 + $0x38] sm:$0xff] %vm1005_vm3, %v1004_v4  ;;  %v1024_v42 = vmul.f32 %v1824_v41, %v1004_v4  ;;  %vm1142_vm5 = vweird.f32 %v1497_v18 }
 0x129   : > { %v1073_v1 = vadd.f32 1.0, %v1499_v19  ;;  %vm1143_vm7 = vmor %vm1141_vm6, %vm1142_vm5 }
 0x12a   : > { %1207 = vst.msk [vmem:[%s1908_s16 + $0x18] sm:$0xff] %vm1005_vm3, %v1199_v38  ;;  %v1138_v43 = vsub.f32 1.0, %v1137_v40  ;;  %v1978_v45 = vadd.f32 %v1832_v21, %v1024_v42 }
 0x12b   : > { %1502 = vrcp.f32 %v1073_v1  ;;  %v1160_v55 = vand.u32 2147483647, %v1073_v1  ;;  %v1162_v56 = vand.u32 2147483648, %v1073_v1  ;;  %vm1156_vm10 = vweird.f32 %v1073_v1 }
 0x12c   : > { %v1501_v23 = vpop.eup %1500  ;;  %v1139_v16 = vmul.f32 %v1497_v18, %v1138_v43  ;;  %1043 = vst.msk [vmem:[%s1841_s13 + $0x38] sm:$0xff] %vm1005_vm3, %v1978_v45  ;;  %v1459_v62 = vmul.f32 -1.442695, %v1978_v45 }
 0x12d   : > { %v1074_v41 = vadd.f32 1.0, %v1501_v23  ;;  %vm1161_vm12 = vcmp.eq.f32.partialorder %v1160_v55, 8.507059e+37 }
 0x12e   : > { %v1140_v7 = vadd.f32 %v1497_v18, %v1139_v16  ;;  %1504 = vpow2.f32 %v1459_v62 }
 0x12f   : > { %1506 = vrcp.f32 %v1074_v41  ;;  %v1177_v26 = vand.u32 2147483648, %v1074_v41  ;;  %v1175_v63 = vand.u32 2147483647, %v1074_v41  ;;  %vm1171_vm14 = vweird.f32 %v1074_v41 }
 0x130   : > { %v1144_v21 = vsel %vm1143_vm7, %v1497_v18, %v1140_v7 }
 0x131   : > { %v1503_v13 = vpop.eup %1502  ;;  %v1149_v25 = vsel %vm1146_vm8, %v1148_v46, %v1144_v21  ;;  %v1178_v11 = vor.u32 1.1754944e-38, %v1177_v26  ;;  %vm1176_vm0 = vcmp.eq.f32.partialorder %v1175_v63, 8.507059e+37 }
 0x132   : > { %v1200_v50 = vmul.f32 %v1149_v25, %v1923_v6  ;;  %v1152_v52 = vmul.f32 %v1503_v13, %v1073_v1  ;;  %vm1157_vm9 = vweird.f32 %v1503_v13  ;;  %v1163_v6 = vor.u32 1.1754944e-38, %v1162_v56 }
 0x133   : > { %vm1158_vm11 = vmor %vm1156_vm10, %vm1157_vm9 }
 0x134   : > { %v1505_v53 = vpop.eup %1504  ;;  %1208 = vst.msk [vmem:[%s1908_s16 + $0x20] sm:$0xff] %vm1005_vm3, %v1200_v50  ;;  %v1153_v51 = vsub.f32 1.0, %v1152_v52 }
 0x135   : > { %v1507_v8 = vpop.eup %1506  ;;  %v1075_v10 = vadd.f32 1.0, %v1505_v53 }
 0x136   : > { %v1154_v57 = vmul.f32 %v1503_v13, %v1153_v51  ;;  %v1167_v29 = vmul.f32 %v1507_v8, %v1074_v41  ;;  %vm1172_vm13 = vweird.f32 %v1507_v8 }
 0x137   : > { %1508 = vrcp.f32 %v1075_v10  ;;  %vm1173_vm15 = vmor %vm1171_vm14, %vm1172_vm13  ;;  %v1192_v20 = vand.u32 2147483648, %v1075_v10  ;;  %vm1186_vm2 = vweird.f32 %v1075_v10 }
 0x138   : > { %v1155_v58 = vadd.f32 %v1503_v13, %v1154_v57  ;;  %v1168_v59 = vsub.f32 1.0, %v1167_v29 }
 0x139   : > { %v1193_v32 = vor.u32 1.1754944e-38, %v1192_v20 }
 0x13a   : > { %v1159_v60 = vsel %vm1158_vm11, %v1503_v13, %v1155_v58  ;;  %v1169_v5 = vmul.f32 %v1507_v8, %v1168_v59 }
 0x13b   : > { %v1164_v24 = vsel %vm1161_vm12, %v1163_v6, %v1159_v60 }
 0x13c   : > { %v1201_v27 = vmul.f32 %v1164_v24, %v1946_v17  ;;  %v1170_v28 = vadd.f32 %v1507_v8, %v1169_v5  ;;  %v1190_v17 = vand.u32 2147483647, %v1075_v10 }
 0x13d   : > { %v1509_v48 = vpop.eup %1508 }
 0x13e   : > { %1209 = vst.msk [vmem:[%s1908_s16 + $0x28] sm:$0xff] %vm1005_vm3, %v1201_v27  ;;  %v1174_v12 = vsel %vm1173_vm15, %v1507_v8, %v1170_v28  ;;  %v1182_v49 = vmul.f32 %v1509_v48, %v1075_v10  ;;  %vm1187_vm1 = vweird.f32 %v1509_v48  ;;  %vm1191_vm5 = vcmp.eq.f32.partialorder %v1190_v17, 8.507059e+37 }
 0x13f   : > { %v1179_v0 = vsel %vm1176_vm0, %v1178_v11, %v1174_v12  ;;  %vm1188_vm4 = vmor %vm1186_vm2, %vm1187_vm1 }
 0x140   : > { %v1202_v30 = vmul.f32 %v1179_v0, %v1963_v39  ;;  %v1183_v31 = vsub.f32 1.0, %v1182_v49 }
 0x142   : > { %1210 = vst.msk [vmem:[%s1908_s16 + $0x30] sm:$0xff] %vm1005_vm3, %v1202_v30  ;;  %v1184_v14 = vmul.f32 %v1509_v48, %v1183_v31 }
 0x144   : > { %v1185_v2 = vadd.f32 %v1509_v48, %v1184_v14 }
 0x146   : > { %v1189_v61 = vsel %vm1188_vm4, %v1509_v48, %v1185_v2 }
 0x147   : > { %v1194_v9 = vsel %vm1191_vm5, %v1193_v32, %v1189_v61 }
 0x148   : > { %v1203_v33 = vmul.f32 %v1194_v9, %v1978_v45 }
 0x14a   : > { %1211 = vst.msk [vmem:[%s1908_s16 + $0x38] sm:$0xff] %vm1005_vm3, %v1203_v33 }
 0x14b PF: > { %s20_s30 = sadd.s32 1, %s1516_s30  }
 0x14c   : > { %p17_p4 = scmp.ge.s32.totalorder %s20_s30, 4  }
 0x14e   :  { %19 = sbr.rel (!%p17_p4) target bundleno = 1 (0x1), region = 121 }

</bundles_post_ra>
